<compile_context>
chip_gen: v7x
topology: tpu7x:2x2x1
jax: 0.10.0
libtpu: 0.0.40
codegen_flags: <defaults>
</compile_context>

<pallas_src>
import jax
import jax.numpy as jnp
from jax.experimental import pallas as pl
from jax.experimental.pallas import tpu as pltpu

K_GAIN = 1.0
A_AMP = 0.1


def _round_up(n, m):
    return ((n + m - 1) // m) * m


def segway_track_kernel(params_ref, x_ref, o_ref):
    # params_ref: SMEM (6,) f32 = [-1.8*u, -10.9*u, 9.3*u, 38.6*u, ref(t), ref_dot(t)]
    a0 = params_ref[0]
    a1 = params_ref[1]
    b0 = params_ref[2]
    b1 = params_ref[3]
    ref_v = params_ref[4]
    ref_dot_v = params_ref[5]

    # x_ref block: (3, TILE) -- rows are phi / eps / phi_dot, batch on lanes.
    phi = x_ref[0:1, :]
    eps = x_ref[1:2, :]
    phi_dot = x_ref[2:3, :]
    v = eps + ref_v

    c = jnp.cos(phi)
    s = jnp.sin(phi)
    pd2 = phi_dot * phi_dot

    inv1 = pl.reciprocal(c - 24.7, approx=False)
    inv2 = pl.reciprocal(c * c - 24.7, approx=False)

    # Direct sublane-row writes; no lane-axis concatenation.
    o_ref[0:1, :] = phi_dot
    o_ref[1:2, :] = (c * (a0 + 11.5 * v + 9.8 * s)
                     + a1 + 68.4 * v - 1.2 * pd2 * s) * inv1 - ref_dot_v
    o_ref[2:3, :] = ((b0 - 58.8 * v) * c + b1 - 234.5 * v
                     - s * (208.3 + pd2 * c)) * inv2


def segway_track_forward(x, u=0.0, t=0.0, *, tile_b=1024):
    """Pallas implementation of SegwayTrack.forward.

    x: (B, 3) float32 state. u, t: python/scalar floats.
    Returns (B, 3) float32 state derivative.
    """
    B, D = x.shape
    assert D == 3

    # ref(t) / ref_dot(t) are scalar functions of t; u-dependent constants are
    # pre-folded on the host so the kernel does only vector ops.
    ref_v = A_AMP * K_GAIN * jnp.cos(K_GAIN * t)
    ref_dot_v = -A_AMP * (K_GAIN ** 2) * jnp.sin(K_GAIN * t)
    params = jnp.stack([
        jnp.float32(-1.8 * u),
        jnp.float32(-10.9 * u),
        jnp.float32(9.3 * u),
        jnp.float32(38.6 * u),
        jnp.asarray(ref_v, dtype=jnp.float32),
        jnp.asarray(ref_dot_v, dtype=jnp.float32),
    ])

    # Lane tile: multiple of 128, big (default 1024) but no larger than needed.
    tile = _round_up(min(tile_b, _round_up(B, 128)), 128)
    b_padded = _round_up(B, tile)

    x_t = x.T.astype(jnp.float32)                   # (3, B), batch on lanes
    if b_padded != B:
        x_t = jnp.pad(x_t, ((0, 0), (0, b_padded - B)))

    grid = (b_padded // tile,)
    out_t = pl.pallas_call(
        segway_track_kernel,
        out_shape=jax.ShapeDtypeStruct((3, b_padded), jnp.float32),
        grid=grid,
        in_specs=[
            pl.BlockSpec(memory_space=pltpu.MemorySpace.SMEM),      # scalars
            pl.BlockSpec((3, tile), lambda i: (0, i)),              # x tile
        ],
        out_specs=pl.BlockSpec((3, tile), lambda i: (0, i)),
        compiler_params=pltpu.CompilerParams(
            dimension_semantics=("parallel",)),
    )(params, x_t)

    return out_t[:, :B].T


def segway_track_reference(x, u=0.0, t=0.0):
    """Pure-JAX reference mirroring the PyTorch forward."""
    ref_v = A_AMP * K_GAIN * jnp.cos(K_GAIN * t)
    ref_dot_v = -A_AMP * (K_GAIN ** 2) * jnp.sin(K_GAIN * t)
    phi = x[:, 0:1]
    eps = x[:, 1:2]
    phi_dot = x[:, 2:3]
    v = eps + ref_v
    c = jnp.cos(phi)
    s = jnp.sin(phi)
    col1 = (c * (-1.8 * u + 11.5 * v + 9.8 * s)
            - 10.9 * u + 68.4 * v - 1.2 * phi_dot * phi_dot * s) / (c - 24.7) - ref_dot_v
    col2 = ((9.3 * u - 58.8 * v) * c + 38.6 * u - 234.5 * v
            - s * (208.3 + phi_dot * phi_dot * c)) / (c * c - 24.7)
    return jnp.concatenate([phi_dot, col1, col2], axis=1)


if __name__ == "__main__":
    key = jax.random.PRNGKey(0)
    B = 16                              # batch of states (any size works now)
    x = jax.random.normal(key, (B, 3), dtype=jnp.float32)
    u = 0.5
    t = 0.3

    out = segway_track_forward(x, u=u, t=t)
    out = jax.block_until_ready(out)

    ref_out = segway_track_reference(x, u=u, t=t)
    assert out.shape == (B, 3)
    assert jnp.allclose(out, ref_out, atol=1e-5, rtol=1e-5)

    print("KERNEL_OK")
</pallas_src>

<mosaic_0001>
module attributes {stable_mosaic.version = 11 : i64} {
  func.func @segway_track_kernel(%arg0: i32, %arg1: memref<6xf32, #tpu.memory_space<smem>>, %arg2: memref<3x128xf32, #tpu.memory_space<vmem>>, %arg3: memref<3x128xf32, #tpu.memory_space<vmem>>) attributes {dimension_semantics = [#tpu.dimension_semantics<parallel>], iteration_bounds = array<i64: 1>, scalar_prefetch = 0 : i64, scratch_operands = 0 : i64, tpu.core_type = #tpu.core_type<tc>, window_params = [{transform_indices = @transform_0, window_bounds = array<i64: 6>}, {transform_indices = @transform_1, window_bounds = array<i64: 3, 128>}, {transform_indices = @transform_2, window_bounds = array<i64: 3, 128>}]} {
    %c0 = arith.constant 0 : index
    %0 = memref.load %arg1[%c0] : memref<6xf32, #tpu.memory_space<smem>>
    %c1 = arith.constant 1 : index
    %1 = memref.load %arg1[%c1] : memref<6xf32, #tpu.memory_space<smem>>
    %c2 = arith.constant 2 : index
    %2 = memref.load %arg1[%c2] : memref<6xf32, #tpu.memory_space<smem>>
    %c3 = arith.constant 3 : index
    %3 = memref.load %arg1[%c3] : memref<6xf32, #tpu.memory_space<smem>>
    %c4 = arith.constant 4 : index
    %4 = memref.load %arg1[%c4] : memref<6xf32, #tpu.memory_space<smem>>
    %c5 = arith.constant 5 : index
    %5 = memref.load %arg1[%c5] : memref<6xf32, #tpu.memory_space<smem>>
    %c0_0 = arith.constant 0 : index
    %c0_1 = arith.constant 0 : index
    %6 = vector.load %arg2[%c0_0, %c0_1] : memref<3x128xf32, #tpu.memory_space<vmem>>, vector<1x128xf32>
    %c1_2 = arith.constant 1 : index
    %c0_3 = arith.constant 0 : index
    %7 = vector.load %arg2[%c1_2, %c0_3] : memref<3x128xf32, #tpu.memory_space<vmem>>, vector<1x128xf32>
    %c2_4 = arith.constant 2 : index
    %c0_5 = arith.constant 0 : index
    %8 = vector.load %arg2[%c2_4, %c0_5] : memref<3x128xf32, #tpu.memory_space<vmem>>, vector<1x128xf32>
    %9 = vector.broadcast %4 : f32 to vector<1x128xf32>
    %10 = arith.addf %7, %9 : vector<1x128xf32>
    %11 = math.cos %6 : vector<1x128xf32>
    %12 = math.sin %6 : vector<1x128xf32>
    %13 = arith.mulf %8, %8 : vector<1x128xf32>
    %cst = arith.constant 2.470000e+01 : f32
    %14 = vector.broadcast %cst : f32 to vector<1x128xf32>
    %15 = arith.subf %11, %14 : vector<1x128xf32>
    %16 = tpu.reciprocal %15 : vector<1x128xf32> -> vector<1x128xf32>
    %17 = arith.mulf %11, %11 : vector<1x128xf32>
    %cst_6 = arith.constant 2.470000e+01 : f32
    %18 = vector.broadcast %cst_6 : f32 to vector<1x128xf32>
    %19 = arith.subf %17, %18 : vector<1x128xf32>
    %20 = tpu.reciprocal %19 : vector<1x128xf32> -> vector<1x128xf32>
    %c0_7 = arith.constant 0 : index
    %c0_8 = arith.constant 0 : index
    %21 = vector.load %arg3[%c0_7, %c0_8] : memref<3x128xf32, #tpu.memory_space<vmem>>, vector<1x128xf32>
    tpu.vector_store %arg3[%c0_7, %c0_8], %8 {strides = array<i32>} : memref<3x128xf32, #tpu.memory_space<vmem>>, vector<1x128xf32>,
    %cst_9 = arith.constant 1.150000e+01 : f32
    %22 = vector.broadcast %cst_9 : f32 to vector<1x128xf32>
    %23 = arith.mulf %22, %10 : vector<1x128xf32>
    %24 = vector.broadcast %0 : f32 to vector<1x128xf32>
    %25 = arith.addf %24, %23 : vector<1x128xf32>
    %cst_10 = arith.constant 9.800000e+00 : f32
    %26 = vector.broadcast %cst_10 : f32 to vector<1x128xf32>
    %27 = arith.mulf %26, %12 : vector<1x128xf32>
    %28 = arith.addf %25, %27 : vector<1x128xf32>
    %29 = arith.mulf %11, %28 : vector<1x128xf32>
    %30 = vector.broadcast %1 : f32 to vector<1x128xf32>
    %31 = arith.addf %29, %30 : vector<1x128xf32>
    %cst_11 = arith.constant 6.840000e+01 : f32
    %32 = vector.broadcast %cst_11 : f32 to vector<1x128xf32>
    %33 = arith.mulf %32, %10 : vector<1x128xf32>
    %34 = arith.addf %31, %33 : vector<1x128xf32>
    %cst_12 = arith.constant 1.200000e+00 : f32
    %35 = vector.broadcast %cst_12 : f32 to vector<1x128xf32>
    %36 = arith.mulf %35, %13 : vector<1x128xf32>
    %37 = arith.mulf %36, %12 : vector<1x128xf32>
    %38 = arith.subf %34, %37 : vector<1x128xf32>
    %39 = arith.mulf %38, %16 : vector<1x128xf32>
    %40 = vector.broadcast %5 : f32 to vector<1x128xf32>
    %41 = arith.subf %39, %40 : vector<1x128xf32>
    %c1_13 = arith.constant 1 : index
    %c0_14 = arith.constant 0 : index
    %42 = vector.load %arg3[%c1_13, %c0_14] : memref<3x128xf32, #tpu.memory_space<vmem>>, vector<1x128xf32>
    tpu.vector_store %arg3[%c1_13, %c0_14], %41 {strides = array<i32>} : memref<3x128xf32, #tpu.memory_space<vmem>>, vector<1x128xf32>,
    %cst_15 = arith.constant 5.880000e+01 : f32
    %43 = vector.broadcast %cst_15 : f32 to vector<1x128xf32>
    %44 = arith.mulf %43, %10 : vector<1x128xf32>
    %45 = vector.broadcast %2 : f32 to vector<1x128xf32>
    %46 = arith.subf %45, %44 : vector<1x128xf32>
    %47 = arith.mulf %46, %11 : vector<1x128xf32>
    %48 = vector.broadcast %3 : f32 to vector<1x128xf32>
    %49 = arith.addf %47, %48 : vector<1x128xf32>
    %cst_16 = arith.constant 2.345000e+02 : f32
    %50 = vector.broadcast %cst_16 : f32 to vector<1x128xf32>
    %51 = arith.mulf %50, %10 : vector<1x128xf32>
    %52 = arith.subf %49, %51 : vector<1x128xf32>
    %53 = arith.mulf %13, %11 : vector<1x128xf32>
    %cst_17 = arith.constant 2.083000e+02 : f32
    %54 = vector.broadcast %cst_17 : f32 to vector<1x128xf32>
    %55 = arith.addf %54, %53 : vector<1x128xf32>
    %56 = arith.mulf %12, %55 : vector<1x128xf32>
    %57 = arith.subf %52, %56 : vector<1x128xf32>
    %58 = arith.mulf %57, %20 : vector<1x128xf32>
    %c2_18 = arith.constant 2 : index
    %c0_19 = arith.constant 0 : index
    %59 = vector.load %arg3[%c2_18, %c0_19] : memref<3x128xf32, #tpu.memory_space<vmem>>, vector<1x128xf32>
    tpu.vector_store %arg3[%c2_18, %c0_19], %58 {strides = array<i32>} : memref<3x128xf32, #tpu.memory_space<vmem>>, vector<1x128xf32>,
    return
  }
  func.func @transform_0(%arg0: i32) -> i32 {
    %c0_i32 = arith.constant 0 : i32
    %c0_i32_0 = arith.constant 0 : i32
    return %c0_i32 : i32
  }
  func.func @transform_1(%arg0: i32) -> (i32, i32) {
    %c0_i32 = arith.constant 0 : i32
    %c0_i32_0 = arith.constant 0 : i32
    return %c0_i32, %arg0 : i32, i32
  }
  func.func @transform_2(%arg0: i32) -> (i32, i32) {
    %c0_i32 = arith.constant 0 : i32
    %c0_i32_0 = arith.constant 0 : i32
    return %c0_i32, %arg0 : i32, i32
  }
}

</mosaic_0001>

<bundles_post_ra>
// kernel: tpu_custom_call.1
= control target key start
LH: loop header
LB: loop body
LE: loop exit
PB: predicated region body
PF: predicated region fallthrough
CT: control target
= control target key end

     0   :  { %7 = vsyncpa [#allocation5], 0  ;;  %s498_s0 = inlined_call_operand.hbm [shape: f32[6], index: 0, kind: input, shape index: {}]   ;;  %s499_s1 = inlined_call_operand.hbm [shape: f32[3,128], index: 1, kind: input, shape index: {}]   ;;  %s500_s2 = inlined_call_operand.hbm [shape: f32[3,128], index: 2, kind: output, shape index: {}]  }
   0x1   :  { %8 = vsyncpa [#allocation3], 0 }
   0x2   :  { %9 = vsyncpa [#allocation4], 0  ;;  %s343_s11 = scalar_lea.hbm %s498_s0, 16 }
   0x3   :  { %p344_p0 = scmp.ne.s32.totalorder %s498_s0, %s343_s11  ;;  %p347_p1 = scmp.lt.u32.totalorder %s343_s11, %s498_s0 }
   0x5   :  { %p349_p2 = pnand %p347_p1, %p344_p0 }
   0x7   :  { %352 = shalt.err (!%p349_p2)
}
   0x8   :  { %s403_s16 = smov [#allocation2]   ;;  %s404_s19 = smov [#allocation6]  }
   0x9   :  { %17 = dma.hbm_to_smem %s498_s0, 16, %s403_s16, [#allocation5]  }
   0xa   :  { %s24_s20 = sshll.u32 %s404_s19, 4  ;;  %s353_s23 = scalar_lea.hbm %s499_s1, 64  ;;  %s25_s20 = int_to_ptr.vmem [resolvable:$true] %s24_s20 }
   0xb   :  { %p354_p3 = scmp.ne.s32.totalorder %s499_s1, %s353_s23  ;;  %p357_p4 = scmp.lt.u32.totalorder %s353_s23, %s499_s1 }
   0xd   :  { %p359_p5 = pnand %p357_p4, %p354_p3 }
   0xf   :  { %362 = shalt.err (!%p359_p5)
}
  0x10   :  { %s363_s28 = scalar_lea.vmem %s25_s20, 64  ;;  %p368_p7 = scmp.lt.s32.totalorder %s25_s20, %s25_s20 }
  0x11   :  { %p364_p6 = scmp.ne.s32.totalorder %s25_s20, %s363_s28  ;;  %p369_p8 = scmp.lt.s32.totalorder %s363_s28, %s363_s28 }
  0x13   :  { %p370_p9 = por %p369_p8, %p368_p7 }
  0x15   :  { %p371_p10 = pnand %p370_p9, %p364_p6 }
  0x17   :  { %374 = shalt.err (!%p371_p10)
}
  0x18   :  { %27 = dma.hbm_to_vmem [thread:$0]  %s499_s1, 64, %s25_s20, [#allocation3]  }
  0x19   :  { %397 = dma.done.wait [#allocation5], 16  }
  0x1a   :  { %398 = vsyncadd [#allocation5], 4294967280 }
  0x1b   :  { %399 = dma.done.wait [#allocation3], 64  }
  0x1c   :  { %400 = vsyncadd [#allocation3], 4294967232 }
  0x1d   :  { %34 = sfence }
  0x1e   :  { %v451_v0 = vld [vmem:[#allocation6] sm:$0x1]  ;;  %v453_v1 = vld [vmem:[#allocation6 + $0x2] sm:$0x1]  ;;  %v405_v13 = vmov 683565275  }
  0x1f   :  { %v49_v2 = vand.u32 2139095040, %v451_v0  ;;  %259 = vst [vmem:[#allocation7] sm:$0x1] %v453_v1  ;;  %v46_v4 = vand.u32 2147483647, %v451_v0  ;;  %vm48_vm7 = vcmp.lt.s32.totalorder %v451_v0, 0  ;;  %vm138_vm15 = vweird.f32 %v451_v0 }
  0x20   :  { %v406_v15 = vmov 2475754826   ;;  %v407_v17 = vmov 2131351028   ;;  %v408_v19 = vmov 2102212464  }
  0x21   :  { %v50_v3 = vshrl.u32 %v49_v2, 23  ;;  %v53_v7 = vand.u32 8388607, %v46_v4  ;;  %v409_v21 = vmov 920167782   ;;  %s310_s1 = sld [smem:[#allocation2 + $0x4]] }
  0x22   :  { %v410_v28 = vmov 1326507024   ;;  %vm47_vm8 = vcmp.le.f32.partialorder %v46_v4, 0.7853982  ;;  %s308_s30 = sld [smem:[#allocation2 + $0x2]]  ;;  %s474_s3 = sld [smem:[#allocation2]]  ;;  %v253_v4 = vmul.f32 %v453_v1, %v453_v1 }
  0x23   :  { %v312_v5 = vadd.s32 4294967169, %v50_v3  ;;  %v54_v10 = vor.u32 8388608, %v53_v7  ;;  %s476_s4 = sld [smem:[#allocation2 + $0x3]]  ;;  %s480_s5 = sld [smem:[#allocation2 + $0x1]] }
  0x24   :  { %s311_s6 = sld [smem:[#allocation2 + $0x5]]  ;;  %s411_s7 = smov [#allocation7]  }
  0x25   :  { %v56_v6 = vadd.s32 1, %v312_v5  ;;  %v94_v30 = vshll.u32 %v54_v10, 8  ;;  %s297_s8 = sshll.u32 %s411_s7, 4  ;;  %s298_s8 = int_to_ptr.vmem [resolvable:$true] %s297_s8 }
  0x26   :  { %s375_s9 = scalar_lea.vmem %s298_s8, 64  ;;  %p380_p12 = scmp.lt.s32.totalorder %s298_s8, %s298_s8 }
  0x27   :  { %vm57_vm0 = vcmp.gt.s32.totalorder %v56_v6, 0  ;;  %p376_p11 = scmp.ne.s32.totalorder %s298_s8, %s375_s9  ;;  %p381_p13 = scmp.lt.s32.totalorder %s375_s9, %s375_s9 }
  0x28   :  { %v58_v8 = vsel %vm57_vm0, %v56_v6, 0 }
  0x29   :  { %v60_v9 = vand.u32 31, %v58_v8  ;;  %v59_v11 = vshrl.u32 %v58_v8, 5  ;;  %p382_p0 = por %p381_p13, %p380_p12 }
  0x2b   :  { %v61_v12 = vsub.s32 32, %v60_v9  ;;  %v63_v14 = vshll.u32 %v405_v13, %v60_v9  ;;  %v66_v16 = vshll.u32 %v406_v15, %v60_v9  ;;  %v69_v18 = vshll.u32 %v407_v17, %v60_v9  ;;  %p383_p1 = pnand %p382_p0, %p376_p11 }
  0x2c   :  { %v72_v20 = vshll.u32 %v408_v19, %v60_v9  ;;  %v75_v22 = vshll.u32 %v409_v21, %v60_v9  ;;  %vm78_vm1 = vcmp.lt.s32.totalorder %v59_v11, 1  ;;  %vm81_vm2 = vcmp.lt.s32.totalorder %v59_v11, 4 }
  0x2d   :  { %v62_v23 = vshrl.u32 %v405_v13, %v61_v12  ;;  %v64_v24 = vshrl.u32 %v406_v15, %v61_v12  ;;  %v67_v25 = vshrl.u32 %v407_v17, %v61_v12  ;;  %v70_v26 = vshrl.u32 %v408_v19, %v61_v12 }
  0x2e   :  { %v73_v27 = vshrl.u32 %v409_v21, %v61_v12  ;;  %v76_v29 = vshrl.u32 %v410_v28, %v61_v12  ;;  %vm79_vm3 = vcmp.lt.s32.totalorder %v59_v11, 2  ;;  %vm80_vm4 = vcmp.lt.s32.totalorder %v59_v11, 3 }
  0x2f   :  { %v65_v31 = vor.u32 %v64_v24, %v63_v14  ;;  %v68_v32 = vor.u32 %v67_v25, %v66_v16  ;;  %v71_v33 = vor.u32 %v70_v26, %v69_v18  ;;  %v44_v24 = vstv %s310_s1 }
  0x30   :  { %v74_v34 = vor.u32 %v73_v27, %v72_v20  ;;  %v77_v35 = vor.u32 %v76_v29, %v75_v22 }
  0x31   :  { %v82_v36 = vsel %vm78_vm1, %v62_v23, %v65_v31  ;;  %v83_v37 = vsel %vm81_vm2, %v71_v33, 2102212464  ;;  %v86_v38 = vsel %vm78_vm1, %v65_v31, %v68_v32  ;;  %v90_v39 = vsel %vm78_vm1, %v68_v32, %v71_v33  ;;  %v42_v23 = vld [vmem:[#allocation6 + $0x1] sm:$0x1] }
  0x32   :  { %v84_v40 = vsel %vm80_vm4, %v68_v32, %v83_v37  ;;  %v87_v41 = vsel %vm81_vm2, %v74_v34, 920167782  ;;  %v91_v42 = vsel %vm81_vm2, %v77_v35, 1326507024  ;;  %v45_v27 = vadd.f32 %v44_v24, %v42_v23 }
  0x33   :  { %v88_v43 = vsel %vm80_vm4, %v71_v33, %v87_v41  ;;  %v92_v44 = vsel %vm80_vm4, %v74_v34, %v91_v42  ;;  %v85_v45 = vsel %vm79_vm3, %v82_v36, %v84_v40  ;;  %v261_v35 = vstv %s474_s3 }
  0x34   :  { %v89_v46 = vsel %vm79_vm3, %v86_v38, %v88_v43  ;;  %v93_v47 = vsel %vm79_vm3, %v90_v39, %v92_v44  ;;  %v101_v52 = vmul.u32 %v94_v30, %v85_v45  ;;  %v277_v29 = vmul.f32 58.8, %v45_v27 }
  0x35   :  { %v460_v48 = vmul.u32.u64.low %v94_v30, %v93_v47  ;;  %v461_v49 = vmul.u32.u64.high %v94_v30, %v93_v47, %v460_v48  ;;  %v463_v50 = vmul.u32.u64.low %v94_v30, %v89_v46  ;;  %v464_v51 = vmul.u32.u64.high %v94_v30, %v89_v46, %v463_v50 }
  0x36   :  { %v278_v30 = vstv %s308_s30  ;;  %v260_v33 = vmul.f32 11.5, %v45_v27  ;;  %v270_v37 = vmul.f32 1.2, %v253_v4  ;;  %v281_v46 = vstv %s476_s4 }
  0x37   :  { %vm103_vm5 = vc.u32 %v461_v49, %v463_v50  ;;  %v104_v53 = vadd.s32 1, %v464_v51  ;;  %v102_v2 = vadd.s32 %v463_v50, %v461_v49  ;;  %v279_v40 = vsub.f32 %v278_v30, %v277_v29 }
  0x38   :  { %v262_v43 = vadd.f32 %v261_v35, %v260_v33 }
  0x39   :  { %v105_v54 = vsel %vm103_vm5, %v104_v53, %v464_v51 }
  0x3a   :  { %v106_v55 = vadd.s32 %v105_v54, %v101_v52 }
  0x3c   :  { %v107_v56 = vadd.s32 536870912, %v106_v55 }
  0x3e   :  { %v108_v57 = vshrl.u32 %v107_v56, 30 }
  0x40   :  { %v109_v58 = vshll.u32 %v108_v57, 30  ;;  %v132_v15 = vsub.s32 4, %v108_v57 }
  0x42   :  { %v110_v59 = vsub.s32 %v106_v55, %v109_v58  ;;  %v133_v18 = vsel %vm48_vm7, %v132_v15, %v108_v57  ;;  %v266_v55 = vstv %s480_s5 }
  0x43   :  { %v135_v21 = vsel %vm47_vm8, 0, %v133_v18 }
  0x44   :  { %v112_v60 = vsub.s32 0, %v110_v59  ;;  %v242_v22 = vadd.s32 3, %v135_v21  ;;  %v139_v25 = vand.u32 3, %v135_v21 }
  0x46   :  { %v313_v61 = vmin.u32 %v112_v60, %v110_v59  ;;  %v243_v26 = vand.u32 3, %v242_v22  ;;  %vm144_vm9 = vcmp.eq.s32.totalorder %v139_v25, 2  ;;  %vm141_vm11 = vcmp.eq.s32.totalorder %v139_v25, 0 }
  0x47   :  { %vm140_vm13 = vcmp.lt.s32.totalorder %v139_v25, 2 }
  0x48   :  { %v114_v62 = vclz %v313_v61  ;;  %vm248_vm10 = vcmp.eq.s32.totalorder %v243_v26, 2  ;;  %vm245_vm12 = vcmp.eq.s32.totalorder %v243_v26, 0  ;;  %vm244_vm14 = vcmp.lt.s32.totalorder %v243_v26, 2 }
  0x4a   :  { %v314_v63 = vadd.s32 4294967294, %v114_v62 }
  0x4c   :  { %vm315_vm6 = vcmp.lt.s32.totalorder %v314_v63, 0 }
  0x4d   :  { %v117_v3 = vsel %vm315_vm6, 0, %v314_v63 }
  0x4e   :  { %v118_v5 = vsub.s32 32, %v117_v3  ;;  %v119_v6 = vshll.u32 %v110_v59, %v117_v3  ;;  %v122_v7 = vsub.s32 4294967266, %v117_v3  ;;  %v268_v59 = vmul.f32 68.4, %v45_v27 }
  0x50   :  { %v120_v8 = vshrl.u32 %v102_v2, %v118_v5  ;;  %v123_v9 = vadd.s32 127, %v122_v7 }
  0x52   :  { %v121_v10 = vor.u32 %v120_v8, %v119_v6  ;;  %v124_v11 = vshll.u32 %v123_v9, 23  ;;  %v274_v6 = vstv %s311_s6 }
  0x54   :  { %v125_v12 = vor.u32 4788187, %v124_v11  ;;  %v128_v13 = vcvt.s32.f32 %v121_v10 }
  0x56   :  { %v126_v14 = vand.u32 2147483647, %v125_v12 }
  0x58   :  { %v129_v16 = vmul.f32 %v128_v13, %v126_v14 }
  0x5a   :  { %v130_v17 = vxor.u32 2147483648, %v129_v16 }
  0x5c   :  { %v131_v19 = vsel %vm48_vm7, %v130_v17, %v129_v16 }
  0x5d   :  { %v134_v20 = vsel %vm47_vm8, %v451_v0, %v131_v19  ;;  %v283_v0 = vmul.f32 234.5, %v45_v27 }
  0x5e   :  { %335 = vcosq.f32 %v134_v20 }
  0x5f   :  { %337 = vsinq.f32 %v134_v20 }
  0x68   :  { %v336_v28 = vpop.eup %335 }
  0x69   :  { %v338_v31 = vpop.eup %337  ;;  %v145_v32 = vxor.u32 2147483648, %v336_v28 }
  0x6a   :  { %v142_v34 = vxor.u32 2147483648, %v338_v31 }
  0x6b   :  { %v146_v1 = vsel %vm144_vm9, %v145_v32, %v338_v31  ;;  %v250_v36 = vsel %vm248_vm10, %v145_v32, %v338_v31 }
  0x6c   :  { %v143_v38 = vsel %vm141_vm11, %v336_v28, %v142_v34  ;;  %v247_v39 = vsel %vm245_vm12, %v336_v28, %v142_v34 }
  0x6d   :  { %v147_v41 = vsel %vm140_vm13, %v143_v38, %v146_v1  ;;  %v251_v42 = vsel %vm244_vm14, %v247_v39, %v250_v36 }
  0x6e   :  { %v148_v44 = vsel %vm138_vm15, nan, %v147_v41  ;;  %v252_v45 = vsel %vm138_vm15, nan, %v251_v42 }
  0x6f   :  { %v263_v47 = vmul.f32 9.8, %v252_v45  ;;  %v271_v48 = vmul.f32 %v270_v37, %v252_v45  ;;  %v285_v49 = vmul.f32 %v253_v4, %v148_v44  ;;  %v320_v50 = vadd.f32 -24.7, %v148_v44 }
  0x70   :  { %v256_v51 = vmul.f32 %v148_v44, %v148_v44  ;;  %v280_v52 = vmul.f32 %v279_v40, %v148_v44 }
  0x71   :  { %v286_v53 = vadd.f32 208.3, %v285_v49  ;;  %339 = vrcp.f32 %v320_v50  ;;  %v264_v54 = vadd.f32 %v263_v47, %v262_v43 }
  0x72   :  { %v321_v56 = vadd.f32 -24.7, %v256_v51  ;;  %v282_v57 = vadd.f32 %v281_v46, %v280_v52 }
  0x73   :  { %v265_v58 = vmul.f32 %v264_v54, %v148_v44  ;;  %v287_v60 = vmul.f32 %v286_v53, %v252_v45 }
  0x74   :  { %341 = vrcp.f32 %v321_v56  ;;  %v284_v61 = vsub.f32 %v282_v57, %v283_v0 }
  0x75   :  { %v267_v62 = vadd.f32 %v266_v55, %v265_v58 }
  0x76   :  { %v288_v63 = vsub.f32 %v284_v61, %v287_v60 }
  0x77   :  { %v269_v2 = vadd.f32 %v268_v59, %v267_v62 }
  0x79   :  { %v272_v3 = vsub.f32 %v269_v2, %v271_v48 }
  0x7b   :  { %v340_v5 = vpop.eup %339 }
  0x7c   :  { %v273_v7 = vmul.f32 %v340_v5, %v272_v3 }
  0x7e   :  { %v342_v8 = vpop.eup %341  ;;  %v275_v9 = vsub.f32 %v273_v7, %v274_v6 }
  0x7f   :  { %v289_v10 = vmul.f32 %v342_v8, %v288_v63 }
  0x80   :  { %276 = vst [vmem:[#allocation7 + $0x1] sm:$0x1] %v275_v9 }
  0x81   :  { %290 = vst [vmem:[#allocation7 + $0x2] sm:$0x1] %v289_v10 }
  0x82   :  { %386 = shalt.err (!%p383_p1)
}
  0x83   :  { %s387_s12 = scalar_lea.hbm %s500_s2, 64 }
  0x84   :  { %p388_p2 = scmp.ne.s32.totalorder %s500_s2, %s387_s12  ;;  %p391_p3 = scmp.lt.u32.totalorder %s387_s12, %s500_s2 }
  0x86   :  { %p393_p4 = pnand %p391_p3, %p388_p2 }
  0x88   :  { %396 = shalt.err (!%p393_p4)
}
  0x89   :  { %300 = dma.vmem_to_hbm [thread:$0]  %s298_s8, 64, %s500_s2, [#allocation4]  }
  0x8a   :  { %401 = dma.done.wait [#allocation4], 64  }
  0x8b   :  { %402 = vsyncadd [#allocation4], 4294967232 }
  0x8c   :  { %304 = vsyncpa [#allocation3], 1 }
  0x8d   :  { %305 = vsyncpa [#allocation4], 1 }
  0x8e   :  { %306 = vsyncpa [#allocation5], 1 }

</bundles_post_ra>
